<compile_context>
chip_gen: v5e
topology: v5e:2x2
jax: 0.10.0
libtpu: 0.0.40
codegen_flags: <defaults>
</compile_context>

<pallas_src>
import jax
import jax.numpy as jnp
from jax.experimental import pallas as pl
from jax.experimental.pallas import tpu as pltpu


def _round_up(n, m):
    return ((n + m - 1) // m) * m


# --------------------------------------------------------------------------
# Kernel
# --------------------------------------------------------------------------
def _ffn_kernel(x_ref, w1_ref, b1_ref, w2_ref, b2_ref, o_ref, acc_ref):
    # x_ref:  (tm, dm_p)   w1_ref: (dm_p, tk)   b1_ref: (1, tk)  f32
    # w2_ref: (tk, dm_p)   b2_ref: (1, dm_p) f32
    # o_ref:  (tm, dm_p)   acc_ref: (tm, dm_p) f32 scratch
    k = pl.program_id(1)

    # Linear1 slab + bias + ReLU (dropout: eval mode -> identity).
    h = jnp.dot(x_ref[...], w1_ref[...], preferred_element_type=jnp.float32)
    h = jnp.maximum(h + b1_ref[...], 0.0).astype(w2_ref.dtype)

    # Partial Linear2 contribution for this d_ff slab (f32 accumulation).
    part = jnp.dot(h, w2_ref[...], preferred_element_type=jnp.float32)

    @pl.when(k == 0)
    def _first():          # direct assign: saves a zero-init write + readback
        acc_ref[...] = part

    @pl.when(k > 0)
    def _accum():
        acc_ref[...] += part

    # Add b2 exactly once and write the output on the final reduction step.
    @pl.when(k == pl.num_programs(1) - 1)
    def _finalize():
        o_ref[...] = (acc_ref[...] + b2_ref[...]).astype(o_ref.dtype)


# --------------------------------------------------------------------------
# Tile / VMEM planning
# --------------------------------------------------------------------------
def _vmem_budget():
    """Usable scoped-VMEM budget for this TPU generation (bytes)."""
    try:
        cap = int(pltpu.get_tpu_info().vmem_capacity_bytes)
    except Exception:
        cap = 64 << 20                      # conservative (v7x per-TC)
    if cap >= (128 << 20):                  # v5e / v6e
        return 100 << 20
    return max(int(cap * 0.80), 32 << 20)   # v7x: leave compiler headroom


def _vmem_estimate(tm, tk, dm_p, cbytes, obytes):
    """Tight VMEM working-set estimate (bytes) + explicit headroom."""
    x_tiles = 2 * tm * dm_p * cbytes            # double-buffered x rows
    o_tiles = 2 * tm * dm_p * obytes            # double-buffered output rows
    w1_tile = 2 * dm_p * tk * cbytes            # streamed W1 slab
    w2_tile = 2 * tk * dm_p * cbytes            # streamed W2 slab
    b_tiles = 2 * (tk + dm_p) * 4               # f32 biases (tiny)
    acc = tm * dm_p * 4                         # f32 accumulator (not buffered)
    h_interm = tm * tk * 4 + tm * tk * cbytes   # f32 h + cast copy for 2nd dot
    est = x_tiles + o_tiles + w1_tile + w2_tile + b_tiles + acc + h_interm
    return int(est * 1.15) + (2 << 20)


def _choose_tiles(M, df_p, dm_p, cbytes, obytes, budget):
    sub = 16 if cbytes == 2 else 8
    m_align = _round_up(M, sub)

    tm_cands = [t for t in (1024, 768, 512, 256, 128, 64, 32, 16, 8)
                if t <= m_align] or [m_align]
    # Megacore (v7x has 2 TCs): prefer >=2 row tiles when there are enough rows.
    if m_align >= 512:
        two = [t for t in tm_cands if _round_up(m_align, t) // t >= 2]
        if two:
            tm_cands = two

    tk_cands = [t for t in (512, 256, 128) if df_p % t == 0] or [df_p]

    best = None
    for tm in tm_cands:
        tk = next((t for t in tk_cands
                   if _vmem_estimate(tm, t, dm_p, cbytes, obytes) <= budget),
                  None)
        if tk is None:
            continue
        m_p = _round_up(M, tm)
        if best is None:
            best = (tm, tk)
        if (m_p - M) / m_p <= 0.25:     # avoid heavily padded last row tile
            return tm, tk
    return best if best is not None else (tm_cands[-1], tk_cands[-1])


# --------------------------------------------------------------------------
# Wrapper
# --------------------------------------------------------------------------
def prepare_ffn_weights(w1, b1, w2, b2, compute_dtype=jnp.bfloat16):
    """Pad (128-aligned) and cast the weights ONCE, outside the hot path.

    w1: [d_model, d_ff] (already transposed from PyTorch's (out,in));
    b1: [d_ff]; w2: [d_ff, d_model]; b2: [d_model].
    """
    d_model, d_ff = w1.shape
    dm_p = _round_up(d_model, 128)
    df_p = _round_up(d_ff, 128)
    # Zero padding is exact: padded d_model cols of x meet zero W1 rows; padded
    # d_ff cols of W1/b1 give relu(0)=0 and meet zero W2 rows; padded output
    # cols are sliced off.
    w1_p = jnp.pad(w1, ((0, dm_p - d_model), (0, df_p - d_ff))).astype(compute_dtype)
    w2_p = jnp.pad(w2, ((0, df_p - d_ff), (0, dm_p - d_model))).astype(compute_dtype)
    b1_p = jnp.pad(b1.astype(jnp.float32), (0, df_p - d_ff)).reshape(1, df_p)
    b2_p = jnp.pad(b2.astype(jnp.float32), (0, dm_p - d_model)).reshape(1, dm_p)
    return {"w1": w1_p, "b1": b1_p, "w2": w2_p, "b2": b2_p,
            "d_model": d_model, "d_ff": d_ff}


def feed_forward(x, weights, *, tm=None, tk=None):
    """x: [batch, seq, d_model]; weights: output of prepare_ffn_weights."""
    w1_p, b1_p = weights["w1"], weights["b1"]
    w2_p, b2_p = weights["w2"], weights["b2"]
    d_model = weights["d_model"]
    dm_p, df_p = w1_p.shape

    batch, seq, _ = x.shape
    M = batch * seq
    cdtype = w1_p.dtype
    cbytes = jnp.dtype(cdtype).itemsize
    obytes = jnp.dtype(x.dtype).itemsize

    budget = _vmem_budget()
    auto_tm, auto_tk = _choose_tiles(M, df_p, dm_p, cbytes, obytes, budget)
    tm = tm if tm is not None else auto_tm
    tk = tk if tk is not None else auto_tk

    M_p = _round_up(M, tm)
    x2d = x.reshape(M, d_model).astype(cdtype)
    if (M_p, dm_p) != (M, d_model):
        x2d = jnp.pad(x2d, ((0, M_p - M), (0, dm_p - d_model)))

    grid = (M_p // tm, df_p // tk)
    vmem_limit = int(min(max(_vmem_estimate(tm, tk, dm_p, cbytes, obytes),
                             32 << 20), budget))

    out2d = pl.pallas_call(
        _ffn_kernel,
        out_shape=jax.ShapeDtypeStruct((M_p, dm_p), x.dtype),
        grid_spec=pltpu.PrefetchScalarGridSpec(
            num_scalar_prefetch=0,
            grid=grid,
            in_specs=[
                pl.BlockSpec((tm, dm_p), lambda i, k: (i, 0)),   # x rows
                pl.BlockSpec((dm_p, tk), lambda i, k: (0, k)),   # W1 column slab
                pl.BlockSpec((1, tk), lambda i, k: (0, k)),      # b1 slab (f32)
                pl.BlockSpec((tk, dm_p), lambda i, k: (k, 0)),   # W2 row slab
                pl.BlockSpec((1, dm_p), lambda i, k: (0, 0)),    # b2 (f32)
            ],
            out_specs=pl.BlockSpec((tm, dm_p), lambda i, k: (i, 0)),
            scratch_shapes=[pltpu.VMEM((tm, dm_p), jnp.float32)],
        ),
        compiler_params=pltpu.CompilerParams(
            dimension_semantics=("parallel", "arbitrary"),
            vmem_limit_bytes=vmem_limit,
        ),
    )(x2d, w1_p, b1_p, w2_p, b2_p)

    return out2d[:M, :d_model].reshape(batch, seq, d_model)


def _reference(x, w1, b1, w2, b2):
    h = jnp.maximum(jnp.einsum("bsd,df->bsf", x, w1) + b1, 0.0)
    return jnp.einsum("bsf,fd->bsd", h, w2) + b2


if __name__ == "__main__":
    batch, seq, d_model, d_ff = 2, 8, 32, 64

    key = jax.random.PRNGKey(0)
    kx, kw1, kb1, kw2, kb2 = jax.random.split(key, 5)

    x = jax.random.normal(kx, (batch, seq, d_model), dtype=jnp.float32)
    # Weights already transposed to (in_features, out_features).
    w1 = jax.random.normal(kw1, (d_model, d_ff), dtype=jnp.float32) * (1.0 / d_model ** 0.5)
    b1 = jax.random.normal(kb1, (d_ff,), dtype=jnp.float32) * 0.01
    w2 = jax.random.normal(kw2, (d_ff, d_model), dtype=jnp.float32) * (1.0 / d_ff ** 0.5)
    b2 = jax.random.normal(kb2, (d_model,), dtype=jnp.float32) * 0.01

    # Pad + cast weights once (hot path only pads x).
    weights = prepare_ffn_weights(w1, b1, w2, b2, compute_dtype=jnp.bfloat16)

    out = feed_forward(x, weights)
    out = jax.block_until_ready(out)

    ref = _reference(x, w1, b1, w2, b2)
    assert out.shape == (batch, seq, d_model)
    # bf16 matmuls with f32 accumulation -> relaxed tolerance vs f32 reference.
    assert jnp.allclose(out, ref, atol=3e-2, rtol=3e-2), "mismatch vs reference"

    print("KERNEL_OK")
</pallas_src>

<mosaic_0001>
module attributes {stable_mosaic.version = 11 : i64} {
  func.func @_ffn_kernel(%arg0: i32, %arg1: i32, %arg2: memref<16x128xbf16, #tpu.memory_space<vmem>>, %arg3: memref<128x128xbf16, #tpu.memory_space<vmem>>, %arg4: memref<1x128xf32, #tpu.memory_space<vmem>>, %arg5: memref<128x128xbf16, #tpu.memory_space<vmem>>, %arg6: memref<1x128xf32, #tpu.memory_space<vmem>>, %arg7: memref<16x128xf32, #tpu.memory_space<vmem>>, %arg8: memref<16x128xf32, #tpu.memory_space<vmem>>) attributes {dimension_semantics = [#tpu.dimension_semantics<parallel>, #tpu.dimension_semantics<arbitrary>], iteration_bounds = array<i64: 1, 1>, scalar_prefetch = 0 : i64, scratch_operands = 1 : i64, tpu.core_type = #tpu.core_type<tc>, window_params = [{transform_indices = @transform_0, window_bounds = array<i64: 16, 128>}, {transform_indices = @transform_1, window_bounds = array<i64: 128, 128>}, {transform_indices = @transform_2, window_bounds = array<i64: 1, 128>}, {transform_indices = @transform_3, window_bounds = array<i64: 128, 128>}, {pipeline_mode = #tpu.pipeline_mode<synchronous>, transform_indices = @transform_4, window_bounds = array<i64: 1, 128>}, {transform_indices = @transform_5, window_bounds = array<i64: 16, 128>}]} {
    %c0 = arith.constant 0 : index
    %c0_0 = arith.constant 0 : index
    %0 = vector.load %arg2[%c0, %c0_0] : memref<16x128xbf16, #tpu.memory_space<vmem>>, vector<16x128xbf16>
    %c0_1 = arith.constant 0 : index
    %c0_2 = arith.constant 0 : index
    %1 = vector.load %arg3[%c0_1, %c0_2] : memref<128x128xbf16, #tpu.memory_space<vmem>>, vector<128x128xbf16>
    %cst = arith.constant dense<0.000000e+00> : vector<16x128xf32>
    %2 = tpu.matmul %0, %1, %cst {dimension_numbers = #tpu.dot_dimension_numbers<[1], [0], [0], [1], [0, 0, 1, 1], [], []>} : vector<16x128xbf16>, vector<128x128xbf16>, vector<16x128xf32> -> vector<16x128xf32>
    %c0_3 = arith.constant 0 : index
    %c0_4 = arith.constant 0 : index
    %3 = vector.load %arg4[%c0_3, %c0_4] : memref<1x128xf32, #tpu.memory_space<vmem>>, vector<1x128xf32>
    %4 = vector.broadcast %3 : vector<1x128xf32> to vector<16x128xf32>
    %5 = arith.addf %2, %4 : vector<16x128xf32>
    %cst_5 = arith.constant 0.000000e+00 : f32
    %6 = vector.broadcast %cst_5 : f32 to vector<16x128xf32>
    %7 = arith.maximumf %5, %6 : vector<16x128xf32>
    %8 = arith.truncf %7 : vector<16x128xf32> to vector<16x128xbf16>
    %c0_6 = arith.constant 0 : index
    %c0_7 = arith.constant 0 : index
    %9 = vector.load %arg5[%c0_6, %c0_7] : memref<128x128xbf16, #tpu.memory_space<vmem>>, vector<128x128xbf16>
    %cst_8 = arith.constant dense<0.000000e+00> : vector<16x128xf32>
    %10 = tpu.matmul %8, %9, %cst_8 {dimension_numbers = #tpu.dot_dimension_numbers<[1], [0], [0], [1], [0, 0, 1, 1], [], []>} : vector<16x128xbf16>, vector<128x128xbf16>, vector<16x128xf32> -> vector<16x128xf32>
    %c0_i32 = arith.constant 0 : i32
    %11 = arith.cmpi eq, %arg1, %c0_i32 : i32
    %12 = arith.extui %11 : i1 to i32
    %c0_i32_9 = arith.constant 0 : i32
    %13 = arith.cmpi ne, %12, %c0_i32_9 : i32
    scf.if %13 {
      %c0_14 = arith.constant 0 : index
      %c0_15 = arith.constant 0 : index
      %20 = vector.load %arg8[%c0_14, %c0_15] : memref<16x128xf32, #tpu.memory_space<vmem>>, vector<16x128xf32>
      tpu.vector_store %arg8[%c0_14, %c0_15], %10 {strides = array<i32>} : memref<16x128xf32, #tpu.memory_space<vmem>>, vector<16x128xf32>,
    } else {
    }
    %c0_i32_10 = arith.constant 0 : i32
    %14 = arith.cmpi sgt, %arg1, %c0_i32_10 : i32
    %15 = arith.extui %14 : i1 to i32
    %c0_i32_11 = arith.constant 0 : i32
    %16 = arith.cmpi ne, %15, %c0_i32_11 : i32
    scf.if %16 {
      %c0_14 = arith.constant 0 : index
      %c0_15 = arith.constant 0 : index
      %20 = vector.load %arg8[%c0_14, %c0_15] : memref<16x128xf32, #tpu.memory_space<vmem>>, vector<16x128xf32>
      %21 = arith.addf %20, %10 : vector<16x128xf32>
      %c0_16 = arith.constant 0 : index
      %c0_17 = arith.constant 0 : index
      %22 = vector.load %arg8[%c0_16, %c0_17] : memref<16x128xf32, #tpu.memory_space<vmem>>, vector<16x128xf32>
      tpu.vector_store %arg8[%c0_16, %c0_17], %21 {strides = array<i32>} : memref<16x128xf32, #tpu.memory_space<vmem>>, vector<16x128xf32>,
    } else {
    }
    %c0_i32_12 = arith.constant 0 : i32
    %17 = arith.cmpi eq, %arg1, %c0_i32_12 : i32
    %18 = arith.extui %17 : i1 to i32
    %c0_i32_13 = arith.constant 0 : i32
    %19 = arith.cmpi ne, %18, %c0_i32_13 : i32
    scf.if %19 {
      %c0_14 = arith.constant 0 : index
      %c0_15 = arith.constant 0 : index
      %20 = vector.load %arg8[%c0_14, %c0_15] : memref<16x128xf32, #tpu.memory_space<vmem>>, vector<16x128xf32>
      %c0_16 = arith.constant 0 : index
      %c0_17 = arith.constant 0 : index
      %21 = vector.load %arg6[%c0_16, %c0_17] : memref<1x128xf32, #tpu.memory_space<vmem>>, vector<1x128xf32>
      %22 = vector.broadcast %21 : vector<1x128xf32> to vector<16x128xf32>
      %23 = arith.addf %20, %22 : vector<16x128xf32>
      %c0_18 = arith.constant 0 : index
      %c0_19 = arith.constant 0 : index
      %24 = vector.load %arg7[%c0_18, %c0_19] : memref<16x128xf32, #tpu.memory_space<vmem>>, vector<16x128xf32>
      tpu.vector_store %arg7[%c0_18, %c0_19], %23 {strides = array<i32>} : memref<16x128xf32, #tpu.memory_space<vmem>>, vector<16x128xf32>,
    } else {
    }
    return
  }
  func.func @transform_0(%arg0: i32, %arg1: i32) -> (i32, i32) {
    %c0_i32 = arith.constant 0 : i32
    %c0_i32_0 = arith.constant 0 : i32
    return %arg0, %c0_i32 : i32, i32
  }
  func.func @transform_1(%arg0: i32, %arg1: i32) -> (i32, i32) {
    %c0_i32 = arith.constant 0 : i32
    %c0_i32_0 = arith.constant 0 : i32
    return %c0_i32, %arg1 : i32, i32
  }
  func.func @transform_2(%arg0: i32, %arg1: i32) -> (i32, i32) {
    %c0_i32 = arith.constant 0 : i32
    %c0_i32_0 = arith.constant 0 : i32
    return %c0_i32, %arg1 : i32, i32
  }
  func.func @transform_3(%arg0: i32, %arg1: i32) -> (i32, i32) {
    %c0_i32 = arith.constant 0 : i32
    %c0_i32_0 = arith.constant 0 : i32
    return %arg1, %c0_i32 : i32, i32
  }
  func.func @transform_4(%arg0: i32, %arg1: i32) -> (i32, i32) {
    %c0_i32 = arith.constant 0 : i32
    %c0_i32_0 = arith.constant 0 : i32
    %c0_i32_1 = arith.constant 0 : i32
    return %c0_i32, %c0_i32_0 : i32, i32
  }
  func.func @transform_5(%arg0: i32, %arg1: i32) -> (i32, i32) {
    %c0_i32 = arith.constant 0 : i32
    %c0_i32_0 = arith.constant 0 : i32
    return %arg0, %c0_i32 : i32, i32
  }
}

</mosaic_0001>

<bundles_post_ra>
// kernel: tpu_custom_call.1
= control target key start
LH: loop header
LB: loop body
LE: loop exit
PB: predicated region body
PF: predicated region fallthrough
CT: control target
= control target key end

     0   :  { %10 = vsyncpa [#allocation4], 0  ;;  %s541_s0 = inlined_call_operand.hbm [shape: bf16[16,128], index: 0, kind: input, shape index: {}]   ;;  %s542_s1 = inlined_call_operand.hbm [shape: bf16[128,128], index: 1, kind: input, shape index: {}]   ;;  %s543_s2 = inlined_call_operand.vmem [shape: f32[1,128], index: 2, kind: input, shape index: {}]   ;;  %s544_s3 = inlined_call_operand.hbm [shape: bf16[128,128], index: 3, kind: input, shape index: {}]   ;;  %s545_s4 = inlined_call_operand.vmem [shape: f32[1,128], index: 4, kind: input, shape index: {}]   ;;  %s546_s5 = inlined_call_operand.hbm [shape: f32[16,128], index: 5, kind: output, shape index: {}]  }
   0x1   :  { %11 = vsyncpa [#allocation7], 0 }
   0x2   :  { %12 = vsyncpa [#allocation5], 0  ;;  %s30_s20 = sshll.u32 %s542_s1, 4  ;;  %s485_s21 = smov [#allocation6]   ;;  %s31_s20 = int_to_ptr.hbm [resolvable:$true] %s30_s20 }
   0x3   :  { %s32_s22 = sshll.u32 %s485_s21, 4  ;;  %s17_s25 = sshll.u32 %s541_s0, 4  ;;  %s33_s22 = int_to_ptr.vmem [resolvable:$true] %s32_s22  ;;  %s18_s25 = int_to_ptr.hbm [resolvable:$true] %s17_s25 }
   0x4   :  { %s486_s26 = smov 64   ;;  %s487_s27 = smov 4  }
   0x5   :  { %38 = dma.hbm_to_vmem [thread:$0]  %s31_s20, 1024, %s33_s22, [#allocation7], %s486_s26, %s486_s26, %s487_s27  }
   0x6   :  { %s488_s28 = smov [#allocation3]   ;;  %s45_s7 = sshll.u32 %s544_s3, 4  ;;  %s46_s7 = int_to_ptr.hbm [resolvable:$true] %s45_s7 }
   0x7   :  { %s19_s29 = sshll.u32 %s488_s28, 4  ;;  %s489_s1 = smov [#allocation8]   ;;  %s20_s29 = int_to_ptr.vmem [resolvable:$true] %s19_s29 }
   0x8   :  { %25 = dma.hbm_to_vmem [thread:$0]  %s18_s25, 128, %s20_s29, [#allocation4], %s486_s26, %s486_s26, %s487_s27  }
   0x9   :  { %s47_s8 = sshll.u32 %s489_s1, 4  ;;  %s48_s8 = int_to_ptr.vmem [resolvable:$true] %s47_s8 }
   0xa   :  { %53 = dma.hbm_to_vmem [thread:$0]  %s46_s7, 1024, %s48_s8, [#allocation7], %s486_s26, %s486_s26, %s487_s27  }
   0xb   :  { %479 = dma.done.wait [#allocation4], 128  }
   0xc   :  { %480 = vsyncadd [#allocation4], 4294967168 }
   0xd   :  { %481 = dma.done.wait [#allocation7], 2048  }
   0xe   :  { %482 = vsyncadd [#allocation7], 4294965248  ;;  %v364_v0 = vld [vmem:[#allocation6 + $0x38] sm:$0xff]  ;;  %v363_v1 = vld [vmem:[#allocation6 + $0x30] sm:$0xff]  ;;  %s490_s11 = smov [#allocation9]   ;;  %s491_s15 = smov 128  }
   0xf   :  { %144 = vmatpush.bf16.msra.mxu0 %v364_v0  ;;  %v372_v2 = vld [vmem:[#allocation8 + $0x38] sm:$0xff]  ;;  %v371_v3 = vld [vmem:[#allocation8 + $0x30] sm:$0xff]  ;;  %v362_v4 = vld [vmem:[#allocation6 + $0x28] sm:$0xff]  ;;  %s272_s12 = sshll.u32 %s490_s11, 4  ;;  %s492_s16 = smov 8   ;;  %s273_s12 = int_to_ptr.vmem [resolvable:$true] %s272_s12 }
  0x10   :  { %225 = vmatpush.bf16.msra.mxu1 %v372_v2  ;;  %v370_v5 = vld [vmem:[#allocation8 + $0x28] sm:$0xff]  ;;  %v361_v6 = vld [vmem:[#allocation6 + $0x20] sm:$0xff]  ;;  %v360_v8 = vld [vmem:[#allocation6 + $0x18] sm:$0xff] }
  0x11   :  { %v369_v7 = vld [vmem:[#allocation8 + $0x20] sm:$0xff]  ;;  %v359_v9 = vld [vmem:[#allocation6 + $0x10] sm:$0xff]  ;;  %v358_v10 = vld [vmem:[#allocation6 + $0x8] sm:$0xff] }
  0x12   :  { %v357_v11 = vld [vmem:[#allocation6] sm:$0xff]  ;;  %v356_v12 = vld [vmem:[#allocation3] sm:$0xff]  ;;  %v367_v14 = vld [vmem:[#allocation8 + $0x10] sm:$0xff] }
  0x13   :  { %145 = vmatpush.bf16.msra.mxu0 %v363_v1  ;;  %v368_v13 = vld [vmem:[#allocation8 + $0x18] sm:$0xff]  ;;  %v366_v15 = vld [vmem:[#allocation8 + $0x8] sm:$0xff]  ;;  %v365_v16 = vld [vmem:[#allocation8] sm:$0xff] }
  0x14   :  { %226 = vmatpush.bf16.msra.mxu1 %v371_v3  ;;  %v381_v18 = vld [vmem:[%s543_s2] ss:$0 sm:$0xff]  ;;  %s274_s2 = sshll.u32 %s546_s5, 4  ;;  %s275_s2 = int_to_ptr.hbm [resolvable:$true] %s274_s2 }
  0x15   :  { %v382_v25 = vld [vmem:[%s545_s4] ss:$0 sm:$0xff] }
  0x17   :  { %146 = vmatpush.bf16.msra.mxu0 %v362_v4 }
  0x18   :  { %227 = vmatpush.bf16.msra.mxu1 %v370_v5 }
  0x1b   :  { %147 = vmatpush.bf16.msra.mxu0 %v361_v6 }
  0x1c   :  { %228 = vmatpush.bf16.msra.mxu1 %v369_v7 }
  0x1f   :  { %148 = vmatpush.bf16.msra.mxu0 %v360_v8 }
  0x20   :  { %229 = vmatpush.bf16.msra.mxu1 %v368_v13 }
  0x23   :  { %149 = vmatpush.bf16.msra.mxu0 %v359_v9 }
  0x24   :  { %230 = vmatpush.bf16.msra.mxu1 %v367_v14 }
  0x27   :  { %150 = vmatpush.bf16.msra.mxu0 %v358_v10 }
  0x28   :  { %231 = vmatpush.bf16.msra.mxu1 %v366_v15 }
  0x2b   :  { %151 = vmatpush.bf16.msra.mxu0 %v357_v11 }
  0x2c   :  { %232 = vmatpush.bf16.msra.mxu1 %v365_v16 }
  0x2e   :  { %152 = vmatmul.bf16.vlgmr.msra.gmra.mxu0 %v356_v12 }
  0xab   :  { %v153_v17 = vpop.f32.mrf.mxu0 }
  0xac   :  { %v154_v19 = vadd.f32 %v381_v18, %v153_v17 }
  0xae   :  { %v158_v22 = vmax.f32 %v154_v19, 0.0 }
  0xb3   :  { %v155_v20 = vpop.f32.mrf.mxu0 }
  0xb4   :  { %v156_v21 = vadd.f32 %v381_v18, %v155_v20 }
  0xb6   :  { %v159_v23 = vmax.f32 %v156_v21, 0.0 }
  0xb8   :  { %v160_v24 = vpack.c.bf16 %v159_v23, %v158_v22 }
  0xba   :  { %233 = vmatmul.bf16.vlgmr.msra.gmra.mxu1 %v160_v24 }
 0x137   :  { %v234_v26 = vpop.f32.mrf.mxu1 }
 0x138   :  { %v264_v27 = vadd.f32 %v382_v25, %v234_v26 }
 0x13a   :  { %266 = vst [vmem:[#allocation9] sm:$0xff] %v264_v27 }
 0x13f   :  { %v236_v28 = vpop.f32.mrf.mxu1 }
 0x140   :  { %v265_v29 = vadd.f32 %v382_v25, %v236_v28 }
 0x142   :  { %267 = vst [vmem:[#allocation9 + $0x8] sm:$0xff] %v265_v29 }
 0x143   :  { %280 = dma.vmem_to_hbm [thread:$0]  %s273_s12, 256, %s275_s2, [#allocation5], %s491_s15, %s491_s15, %s492_s16  }
 0x144   :  { %483 = dma.done.wait [#allocation5], 256  }
 0x145   :  { %484 = vsyncadd [#allocation5], 4294967040 }
 0x146   :  { %285 = vsyncpa [#allocation4], 1 }
 0x147   :  { %286 = vsyncpa [#allocation7], 1 }
 0x148   :  { %287 = vsyncpa [#allocation5], 1 }

</bundles_post_ra>
